<compile_context>
chip_gen: v7x
topology: tpu7x:2x2x1
jax: 0.10.0
libtpu: 0.0.40
codegen_flags: <defaults>
</compile_context>

<pallas_src>
import functools

import jax
import jax.numpy as jnp
from jax.experimental import pallas as pl
from jax.experimental.pallas import tpu as pltpu

LEAK = 0.2
EPS = 1e-5
LANE = 128
SUBLANE = 8
HIGHEST = jax.lax.Precision.HIGHEST


def _leaky_relu(v):
    return jnp.where(v > 0, v, LEAK * v)


def _round_up(x, m):
    return (x + m - 1) // m * m


def _pick_tile_hw(hw, cin, cout_p, itemsize):
    """Spatial (lane-axis) tile under a ~6 MiB per-grid-step budget:
    double-buffered x/out streams + f32 intermediates (hd, h, h2, d)."""
    per_col = 2 * (cin + cout_p) * itemsize + 5 * cout_p * 4
    cap = max(LANE, ((6 << 20) // per_col) // LANE * LANE)
    if hw <= cap:
        return hw                      # whole plane per step, still tiny
    best = 0
    t = LANE
    while t <= cap:
        if hw % t == 0:
            best = t
        t += LANE
    # No divisor <= cap: use a multiple-of-128 tile; the partial last block is
    # masked by the Pallas pipeline (spatially elementwise -> no contamination).
    return best if best else cap


def _fused_kernel(x_ref, wcat_ref, bcat_ref, w2_ref, b2_ref,
                  mean_ref, istd_ref, o_ref, *, cout_p):
    x = x_ref[0]                                                # (Cin, T)
    # layer_1 + downsample conv fused: one MXU pass of x per tile.
    hd = jnp.dot(wcat_ref[...], x, preferred_element_type=jnp.float32,
                 precision=HIGHEST) + bcat_ref[...]             # (2*Cout_p, T)
    h = _leaky_relu(hd[:cout_p, :])
    d = hd[cout_p:, :]
    # layer_2 + LeakyReLU
    h = jnp.dot(w2_ref[...], h.astype(w2_ref.dtype),
                preferred_element_type=jnp.float32,
                precision=HIGHEST) + b2_ref[...]
    h = _leaky_relu(h)
    # InstanceNorm2d of the downsample branch with precomputed per-(n, channel)
    # mean / inv-std (padded channels: mean=0, istd=1 -> stay exactly 0).
    d = (d - mean_ref[0]) * istd_ref[0]
    o_ref[0] = _leaky_relu(h + d).astype(o_ref.dtype)


def pixel_shuffle_upsample(x_nchw, params):
    """x_nchw: (N, Cin, H, W) -> (N, Cout, H, W), matching the PyTorch forward
    of PixelShuffleUpsample with stride=1 and in_feature != out_feature."""
    w1, b1, w2, b2, wd, bd = params
    N, Cin, H, W = x_nchw.shape
    Cout = w1.shape[1]
    HW = H * W
    dt = x_nchw.dtype
    itemsize = jnp.dtype(dt).itemsize

    cout_p = _round_up(Cout, SUBLANE)
    pad = cout_p - Cout

    # Transposed weights for the "out = W^T @ x" (channels-on-sublanes) layout,
    # zero-padded to the 8-sublane granule (padded output rows compute exact 0).
    w1t = jnp.pad(w1.T, ((0, pad), (0, 0)))                     # (cout_p, Cin)
    wdt = jnp.pad(wd.T, ((0, pad), (0, 0)))
    wcat = jnp.concatenate([w1t, wdt], axis=0).astype(dt)       # (2*cout_p, Cin)
    w2t = jnp.pad(w2.T, ((0, pad), (0, pad))).astype(dt)        # (cout_p, cout_p)
    b1c = jnp.pad(b1.reshape(-1), (0, pad)).reshape(cout_p, 1)
    bdc = jnp.pad(bd.reshape(-1), (0, pad)).reshape(cout_p, 1)
    bcat = jnp.concatenate([b1c, bdc], axis=0).astype(jnp.float32)
    b2c = jnp.pad(b2.reshape(-1), (0, pad)).reshape(cout_p, 1).astype(jnp.float32)

    # NCHW -> (N, Cin, HW): pure view, no HBM relayout / transpose pass.
    x = x_nchw.reshape(N, Cin, HW)

    # InstanceNorm stats of d = x @ wd + bd from a tiny centered Gram matrix
    # (Cin x Cin) computed by XLA: numerically stable (centered), cheap, and it
    # removes the second in-kernel pass over x.
    xf = x.astype(jnp.float32)
    mean_x = jnp.mean(xf, axis=2)                               # (N, Cin)
    xc = xf - mean_x[:, :, None]
    cov = jnp.einsum("ncs,nds->ncd", xc, xc, precision=HIGHEST) / HW
    mean_d = mean_x @ wd + bd                                   # (N, Cout)
    var_d = jnp.einsum("ncd,ck,dk->nk", cov, wd, wd, precision=HIGHEST)
    istd_d = jax.lax.rsqrt(jnp.maximum(var_d, 0.0) + EPS)
    mean_d = jnp.pad(mean_d, ((0, 0), (0, pad)))[:, :, None]           # (N,cp,1)
    istd_d = jnp.pad(istd_d, ((0, 0), (0, pad)),
                     constant_values=1.0)[:, :, None]                  # (N,cp,1)

    tile = _pick_tile_hw(HW, Cin, cout_p, itemsize)
    n_tiles = pl.cdiv(HW, tile)

    kernel = functools.partial(_fused_kernel, cout_p=cout_p)

    flops = 2 * N * HW * (Cin * 2 * cout_p + cout_p * cout_p)
    bytes_accessed = N * HW * (Cin + cout_p) * itemsize

    out = pl.pallas_call(
        kernel,
        out_shape=jax.ShapeDtypeStruct((N, cout_p, HW), dt),
        grid_spec=pltpu.PrefetchScalarGridSpec(
            num_scalar_prefetch=0,
            grid=(N, n_tiles),
            in_specs=[
                pl.BlockSpec((1, Cin, tile), lambda n, t: (n, 0, t)),
                pl.BlockSpec((2 * cout_p, Cin), lambda n, t: (0, 0)),
                pl.BlockSpec((2 * cout_p, 1), lambda n, t: (0, 0)),
                pl.BlockSpec((cout_p, cout_p), lambda n, t: (0, 0)),
                pl.BlockSpec((cout_p, 1), lambda n, t: (0, 0)),
                pl.BlockSpec((1, cout_p, 1), lambda n, t: (n, 0, 0)),
                pl.BlockSpec((1, cout_p, 1), lambda n, t: (n, 0, 0)),
            ],
            out_specs=pl.BlockSpec((1, cout_p, tile), lambda n, t: (n, 0, t)),
        ),
        compiler_params=pltpu.CompilerParams(
            dimension_semantics=("parallel", "parallel")),
        cost_estimate=pl.CostEstimate(flops=flops, transcendentals=0,
                                      bytes_accessed=bytes_accessed),
    )(x, wcat, bcat, w2t, b2c, mean_d, istd_d)

    out = out[:, :Cout, :]                                      # no-op if pad==0
    return out.reshape(N, Cout, H, W)


def _reference(x_nchw, params):
    """Pure-JAX reference mirroring the PyTorch forward."""
    w1, b1, w2, b2, wd, bd = params
    N, Cin, H, W = x_nchw.shape
    x = jnp.transpose(x_nchw, (0, 2, 3, 1)).reshape(N, H * W, Cin).astype(jnp.float32)
    h = _leaky_relu(jnp.einsum("nsc,cd->nsd", x, w1, precision=HIGHEST) + b1)
    h = _leaky_relu(jnp.einsum("nsc,cd->nsd", h, w2, precision=HIGHEST) + b2)
    d = jnp.einsum("nsc,cd->nsd", x, wd, precision=HIGHEST) + bd
    mean = jnp.mean(d, axis=1, keepdims=True)
    var = jnp.mean((d - mean) ** 2, axis=1, keepdims=True)
    d = (d - mean) * jax.lax.rsqrt(var + EPS)
    out = _leaky_relu(h + d)
    Cout = w1.shape[1]
    return jnp.transpose(out.reshape(N, H, W, Cout), (0, 3, 1, 2))


def init_params(key, in_feature, out_feature):
    """Deterministic init matching the nn.Module shapes. PyTorch Conv2d 1x1
    weights (Cout, Cin, 1, 1) are stored as (Cin, Cout) matrices, biases (1, Cout)."""
    ks = jax.random.split(key, 6)
    s1 = 1.0 / jnp.sqrt(in_feature)
    s2 = 1.0 / jnp.sqrt(out_feature)
    w1 = jax.random.uniform(ks[0], (in_feature, out_feature), jnp.float32, -s1, s1)
    b1 = jax.random.uniform(ks[1], (1, out_feature), jnp.float32, -s1, s1)
    w2 = jax.random.uniform(ks[2], (out_feature, out_feature), jnp.float32, -s2, s2)
    b2 = jax.random.uniform(ks[3], (1, out_feature), jnp.float32, -s2, s2)
    wd = jax.random.uniform(ks[4], (in_feature, out_feature), jnp.float32, -s1, s1)
    bd = jax.random.uniform(ks[5], (1, out_feature), jnp.float32, -s1, s1)
    return (w1, b1, w2, b2, wd, bd)


if __name__ == "__main__":
    key = jax.random.PRNGKey(0)
    k_x, k_p = jax.random.split(key)

    # in_feature != out_feature -> downsample + InstanceNorm branch active
    N, Cin, Cout, H, W = 2, 4, 8, 16, 16
    x = jax.random.normal(k_x, (N, Cin, H, W), jnp.float32)
    params = init_params(k_p, Cin, Cout)

    out = jax.block_until_ready(pixel_shuffle_upsample(x, params))
    ref = jax.block_until_ready(_reference(x, params))

    assert out.shape == (N, Cout, H, W)
    err = float(jnp.max(jnp.abs(out - ref)))
    assert jnp.allclose(out, ref, atol=1e-3, rtol=1e-3), err
    print("KERNEL_OK")
</pallas_src>

<mosaic_0001>
module attributes {stable_mosaic.version = 11 : i64} {
  func.func @_fused_kernel(%arg0: i32, %arg1: i32, %arg2: memref<1x4x256xf32, #tpu.memory_space<vmem>>, %arg3: memref<16x4xf32, #tpu.memory_space<vmem>>, %arg4: memref<16x1xf32, #tpu.memory_space<vmem>>, %arg5: memref<8x8xf32, #tpu.memory_space<vmem>>, %arg6: memref<8x1xf32, #tpu.memory_space<vmem>>, %arg7: memref<1x8x1xf32, #tpu.memory_space<vmem>>, %arg8: memref<1x8x1xf32, #tpu.memory_space<vmem>>, %arg9: memref<1x8x256xf32, #tpu.memory_space<vmem>>) attributes {dimension_semantics = [#tpu.dimension_semantics<parallel>, #tpu.dimension_semantics<parallel>], iteration_bounds = array<i64: 2, 1>, scalar_prefetch = 0 : i64, scratch_operands = 0 : i64, tpu.core_type = #tpu.core_type<tc>, window_params = [{transform_indices = @transform_0, window_bounds = array<i64: 1, 4, 256>}, {pipeline_mode = #tpu.pipeline_mode<synchronous>, transform_indices = @transform_1, window_bounds = array<i64: 16, 4>}, {pipeline_mode = #tpu.pipeline_mode<synchronous>, transform_indices = @transform_2, window_bounds = array<i64: 16, 1>}, {pipeline_mode = #tpu.pipeline_mode<synchronous>, transform_indices = @transform_3, window_bounds = array<i64: 8, 8>}, {pipeline_mode = #tpu.pipeline_mode<synchronous>, transform_indices = @transform_4, window_bounds = array<i64: 8, 1>}, {transform_indices = @transform_5, window_bounds = array<i64: 1, 8, 1>}, {transform_indices = @transform_6, window_bounds = array<i64: 1, 8, 1>}, {transform_indices = @transform_7, window_bounds = array<i64: 1, 8, 256>}]} {
    %c0 = arith.constant 0 : index
    %c0_0 = arith.constant 0 : index
    %c0_1 = arith.constant 0 : index
    %0 = vector.load %arg2[%c0, %c0_0, %c0_1] : memref<1x4x256xf32, #tpu.memory_space<vmem>>, vector<1x4x256xf32>
    %1 = vector.shape_cast %0 : vector<1x4x256xf32> to vector<4x256xf32>
    %c0_2 = arith.constant 0 : index
    %c0_3 = arith.constant 0 : index
    %2 = vector.load %arg3[%c0_2, %c0_3] : memref<16x4xf32, #tpu.memory_space<vmem>>, vector<16x4xf32>
    %cst = arith.constant dense<0.000000e+00> : vector<16x256xf32>
    %3 = tpu.matmul %2, %1, %cst {dimension_numbers = #tpu.dot_dimension_numbers<[1], [0], [0], [1], [0, 0, 1, 1], [], []>, precision = #tpu.contract_precision<fp32>} : vector<16x4xf32>, vector<4x256xf32>, vector<16x256xf32> -> vector<16x256xf32>
    %c0_4 = arith.constant 0 : index
    %c0_5 = arith.constant 0 : index
    %4 = vector.load %arg4[%c0_4, %c0_5] : memref<16x1xf32, #tpu.memory_space<vmem>>, vector<16x1xf32>
    %5 = vector.broadcast %4 : vector<16x1xf32> to vector<16x256xf32>
    %6 = arith.addf %3, %5 : vector<16x256xf32>
    %7 = vector.extract_strided_slice %6 {offsets = [0, 0], sizes = [8, 256], strides = [1, 1]} : vector<16x256xf32> to vector<8x256xf32>
    %cst_6 = arith.constant 0.000000e+00 : f32
    %8 = vector.broadcast %cst_6 : f32 to vector<8x256xf32>
    %9 = arith.cmpf ogt, %7, %8 : vector<8x256xf32>
    %cst_7 = arith.constant 2.000000e-01 : f32
    %10 = vector.broadcast %cst_7 : f32 to vector<8x256xf32>
    %11 = arith.mulf %10, %7 : vector<8x256xf32>
    %12 = arith.select %9, %7, %11 : vector<8x256xi1>, vector<8x256xf32>
    %13 = vector.extract_strided_slice %6 {offsets = [8, 0], sizes = [8, 256], strides = [1, 1]} : vector<16x256xf32> to vector<8x256xf32>
    %c0_8 = arith.constant 0 : index
    %c0_9 = arith.constant 0 : index
    %14 = vector.load %arg5[%c0_8, %c0_9] : memref<8x8xf32, #tpu.memory_space<vmem>>, vector<8x8xf32>
    %cst_10 = arith.constant dense<0.000000e+00> : vector<8x256xf32>
    %15 = tpu.matmul %14, %12, %cst_10 {dimension_numbers = #tpu.dot_dimension_numbers<[1], [0], [0], [1], [0, 0, 1, 1], [], []>, precision = #tpu.contract_precision<fp32>} : vector<8x8xf32>, vector<8x256xf32>, vector<8x256xf32> -> vector<8x256xf32>
    %c0_11 = arith.constant 0 : index
    %c0_12 = arith.constant 0 : index
    %16 = vector.load %arg6[%c0_11, %c0_12] : memref<8x1xf32, #tpu.memory_space<vmem>>, vector<8x1xf32>
    %17 = vector.broadcast %16 : vector<8x1xf32> to vector<8x256xf32>
    %18 = arith.addf %15, %17 : vector<8x256xf32>
    %cst_13 = arith.constant 0.000000e+00 : f32
    %19 = vector.broadcast %cst_13 : f32 to vector<8x256xf32>
    %20 = arith.cmpf ogt, %18, %19 : vector<8x256xf32>
    %cst_14 = arith.constant 2.000000e-01 : f32
    %21 = vector.broadcast %cst_14 : f32 to vector<8x256xf32>
    %22 = arith.mulf %21, %18 : vector<8x256xf32>
    %23 = arith.select %20, %18, %22 : vector<8x256xi1>, vector<8x256xf32>
    %c0_15 = arith.constant 0 : index
    %c0_16 = arith.constant 0 : index
    %c0_17 = arith.constant 0 : index
    %24 = vector.load %arg7[%c0_15, %c0_16, %c0_17] : memref<1x8x1xf32, #tpu.memory_space<vmem>>, vector<1x8x1xf32>
    %25 = vector.shape_cast %24 : vector<1x8x1xf32> to vector<8x1xf32>
    %26 = vector.broadcast %25 : vector<8x1xf32> to vector<8x256xf32>
    %27 = arith.subf %13, %26 : vector<8x256xf32>
    %c0_18 = arith.constant 0 : index
    %c0_19 = arith.constant 0 : index
    %c0_20 = arith.constant 0 : index
    %28 = vector.load %arg8[%c0_18, %c0_19, %c0_20] : memref<1x8x1xf32, #tpu.memory_space<vmem>>, vector<1x8x1xf32>
    %29 = vector.shape_cast %28 : vector<1x8x1xf32> to vector<8x1xf32>
    %30 = vector.broadcast %29 : vector<8x1xf32> to vector<8x256xf32>
    %31 = arith.mulf %27, %30 : vector<8x256xf32>
    %32 = arith.addf %23, %31 : vector<8x256xf32>
    %cst_21 = arith.constant 0.000000e+00 : f32
    %33 = vector.broadcast %cst_21 : f32 to vector<8x256xf32>
    %34 = arith.cmpf ogt, %32, %33 : vector<8x256xf32>
    %cst_22 = arith.constant 2.000000e-01 : f32
    %35 = vector.broadcast %cst_22 : f32 to vector<8x256xf32>
    %36 = arith.mulf %35, %32 : vector<8x256xf32>
    %37 = arith.select %34, %32, %36 : vector<8x256xi1>, vector<8x256xf32>
    %c0_23 = arith.constant 0 : index
    %c0_24 = arith.constant 0 : index
    %c0_25 = arith.constant 0 : index
    %38 = vector.load %arg9[%c0_23, %c0_24, %c0_25] : memref<1x8x256xf32, #tpu.memory_space<vmem>>, vector<1x8x256xf32>
    %39 = vector.shape_cast %38 : vector<1x8x256xf32> to vector<8x256xf32>
    %40 = vector.shape_cast %37 : vector<8x256xf32> to vector<1x8x256xf32>
    tpu.vector_store %arg9[%c0_23, %c0_24, %c0_25], %40 {strides = array<i32>} : memref<1x8x256xf32, #tpu.memory_space<vmem>>, vector<1x8x256xf32>,
    return
  }
  func.func @transform_0(%arg0: i32, %arg1: i32) -> (i32, i32, i32) {
    %c0_i32 = arith.constant 0 : i32
    %c0_i32_0 = arith.constant 0 : i32
    return %arg0, %c0_i32, %arg1 : i32, i32, i32
  }
  func.func @transform_1(%arg0: i32, %arg1: i32) -> (i32, i32) {
    %c0_i32 = arith.constant 0 : i32
    %c0_i32_0 = arith.constant 0 : i32
    %c0_i32_1 = arith.constant 0 : i32
    return %c0_i32, %c0_i32_0 : i32, i32
  }
  func.func @transform_2(%arg0: i32, %arg1: i32) -> (i32, i32) {
    %c0_i32 = arith.constant 0 : i32
    %c0_i32_0 = arith.constant 0 : i32
    %c0_i32_1 = arith.constant 0 : i32
    return %c0_i32, %c0_i32_0 : i32, i32
  }
  func.func @transform_3(%arg0: i32, %arg1: i32) -> (i32, i32) {
    %c0_i32 = arith.constant 0 : i32
    %c0_i32_0 = arith.constant 0 : i32
    %c0_i32_1 = arith.constant 0 : i32
    return %c0_i32, %c0_i32_0 : i32, i32
  }
  func.func @transform_4(%arg0: i32, %arg1: i32) -> (i32, i32) {
    %c0_i32 = arith.constant 0 : i32
    %c0_i32_0 = arith.constant 0 : i32
    %c0_i32_1 = arith.constant 0 : i32
    return %c0_i32, %c0_i32_0 : i32, i32
  }
  func.func @transform_5(%arg0: i32, %arg1: i32) -> (i32, i32, i32) {
    %c0_i32 = arith.constant 0 : i32
    %c0_i32_0 = arith.constant 0 : i32
    %c0_i32_1 = arith.constant 0 : i32
    return %arg0, %c0_i32, %c0_i32_0 : i32, i32, i32
  }
  func.func @transform_6(%arg0: i32, %arg1: i32) -> (i32, i32, i32) {
    %c0_i32 = arith.constant 0 : i32
    %c0_i32_0 = arith.constant 0 : i32
    %c0_i32_1 = arith.constant 0 : i32
    return %arg0, %c0_i32, %c0_i32_0 : i32, i32, i32
  }
  func.func @transform_7(%arg0: i32, %arg1: i32) -> (i32, i32, i32) {
    %c0_i32 = arith.constant 0 : i32
    %c0_i32_0 = arith.constant 0 : i32
    return %arg0, %c0_i32, %arg1 : i32, i32, i32
  }
}

</mosaic_0001>

<bundles_post_ra>
// kernel: tpu_custom_call.1
= control target key start
LH: loop header
LB: loop body
LE: loop exit
PB: predicated region body
PF: predicated region fallthrough
CT: control target
= control target key end

     0   :  { %12 = vsyncpa [#allocation3], 0  ;;  %s1926_s0 = inlined_call_operand.vmem [shape: f32[2,4,256], index: 0, kind: input, shape index: {}]   ;;  %s1927_s1 = inlined_call_operand.vmem [shape: f32[16,4], index: 1, kind: input, shape index: {}]   ;;  %s1928_s2 = inlined_call_operand.vmem [shape: f32[16,1], index: 2, kind: input, shape index: {}]   ;;  %s1929_s3 = inlined_call_operand.vmem [shape: f32[8,8], index: 3, kind: input, shape index: {}]   ;;  %s1930_s4 = inlined_call_operand.vmem [shape: f32[8,1], index: 4, kind: input, shape index: {}]   ;;  %s1931_s5 = inlined_call_operand.vmem [shape: f32[2,8,1], index: 5, kind: input, shape index: {}]   ;;  %s1932_s6 = inlined_call_operand.vmem [shape: f32[2,8,1], index: 6, kind: input, shape index: {}]   ;;  %s1933_s7 = inlined_call_operand.hbm [shape: f32[2,8,256], index: 7, kind: output, shape index: {}]  }
   0x1   :  { %14 = vsyncpa [#allocation3 + $0x1], 0  ;;  %s1754_s24 = smov 0   ;;  %s1756_s25 = smov 0  }
   0x2   :  { %s1758_s26 = smov 0   ;;  %s1760_s27 = smov 0  }
   0x3   :  { %s1762_s28 = smov 0   ;;  %s1764_s29 = smov 0  }
   0x4 LB: > { %s1516_s30 = sadd.s32 4294967295, %s1709_s29   ;;  %s1517_s8 = sadd.s32 4294967294, %s1709_s29   ;;  %s1709_s29 = sphi %s1764_s29, %s20_s29   ;;  %s1705_s28 = sphi %s1762_s28, %s1940_s28   ;;  %s1701_s27 = sphi %s1760_s27, %s1939_s27   ;;  %s1697_s26 = sphi %s1758_s26, %s1938_s26   ;;  %s1693_s25 = sphi %s1756_s25, %s1937_s25   ;;  %s1689_s24 = sphi %s1754_s24, %s1936_s24  }
   0x5   : > { %s32_s9 = sadd.s32 1, %s1705_s28  ;;  %s205_s10 = sadd.s32 1, %s1697_s26 }
   0x6   : > { %p34_p0 = scmp.ge.s32.totalorder %s32_s9, 2  ;;  %p215_p1 = scmp.ne.s32.totalorder %s1697_s26, %s1693_s25 }
   0x7   : > { %p216_p2 = scmp.eq.s32.totalorder %s1516_s30, 1  ;;  %p221_p3 = scmp.ne.s32.totalorder %s1693_s25, %s1689_s24 }
   0x8   : > { %s1942_s9 = smov (%p34_p0, %s32_s9), 0  ;;  %p222_p5 = scmp.eq.s32.totalorder %s1517_s8, 1 }
   0x9   : > { %p1794_p4 = por %p216_p2, %p215_p1  ;;  %s200_s12 = ssub.s32 %s1705_s28, %s1942_s9 }
   0xa   : > { %p1520_p6 = scmp.ge.s32.totalorder %s1709_s29, 1  ;;  %p203_p7 = scmp.eq.s32.totalorder %s200_s12, 0 }
   0xb   : > { %p1801_p8 = por %p222_p5, %p221_p3  ;;  %p279_p9 = scmp.lt.s32.totalorder %s1709_s29, 3 }
   0xc   : > { %s1807_s14 = scalar_select %p203_p7, %s1697_s26, %s205_s10  }
   0xd   : > { %p280_p10 = pnand %p1520_p6, %p279_p9 }
   0xe   : > { %p324_p11 = scmp.lt.s32.totalorder (!%p280_p10), %s1701_s27, 1  ;;  %v343_v0 = vld [vmem:[%s1927_s1] sm:$0xff] (!%p280_p10)  ;;  %vm359_vm0 = vcmask (!%p280_p10), 31744   ;;  %v344_v1 = vld [vmem:[%s1927_s1 + $0x8] sm:$0xff] (!%p280_p10)  ;;  %v1711_v2 = vmov (!%p280_p10), 0.0   ;;  %v1712_v9 = vmov (!%p280_p10), 0  }
   0xf   : > { %283 = sbr.rel (%p280_p10) target bundleno = 573 (0x23d), region = 48  ;;  %534 = vmatprep.mubr.f32.mxu0 (!%p280_p10), %v1711_v2  ;;  %v361_v3 = vsel (!%p280_p10), %vm359_vm0, %v343_v0, 0  ;;  %v364_v4 = vsel (!%p280_p10), %vm359_vm0, %v344_v1, 0  ;;  %437 = vmatprep.mubr.f32.mxu1 (!%p280_p10), %v1711_v2  ;;  %v345_v5 = vld [vmem:[%s1928_s2] sm:$0xff] (!%p280_p10)  ;;  %vm366_vm1 = vcmask (!%p280_p10), 1043456   ;;  %v346_v12 = vld [vmem:[%s1928_s2 + $0x8] sm:$0xff] (!%p280_p10) }
  0x10   : > { %v892_v6 = vld [vmem:[%s1930_s4] sm:$0xff] (!%p280_p10)  ;;  %v1825_v7 = vand.u32 (!%p280_p10), 4294901760, %v361_v3  ;;  %v1827_v8 = vand.u32 (!%p280_p10), 4294901760, %v364_v4  ;;  %1628 = vset.pattern.permute.xlu0 (!%p280_p10), %v1712_v9  ;;  %1629 = vset.pattern.permute.xlu1 (!%p280_p10), %v1712_v9  ;;  %vm898_vm2 = vcmask (!%p280_p10), 64512   ;;  %s320_s8 = sand.u32 (!%p280_p10), 1, %s1693_s25   ;;  %s1532_s12 = sshll.u32 (!%p280_p10), %s1701_s27, 8 }
  0x11   : > { %349 = vperm.xlu0 (!%p280_p10), %1628, %v345_v5   ;;  %895 = vperm.xlu1 (!%p280_p10), %1629, %v892_v6   ;;  %v891_v39 = vld [vmem:[%s1929_s3] sm:$0xff] (!%p280_p10)  ;;  %s1521_s10 = sshll.u32 (!%p280_p10), %s320_s8, 4  ;;  %s1713_s21 = smov (!%p280_p10), [#allocation2]  }
  0x12   : > { %v439_v10 = vsub.f32 (!%p280_p10), %v361_v3, %v1825_v7  ;;  %v450_v11 = vsub.f32 (!%p280_p10), %v364_v4, %v1827_v8  ;;  %v900_v40 = vsel (!%p280_p10), %vm898_vm2, %v891_v39, 0  ;;  %s322_s15 = scalar_lea.vmem (!%p280_p10), [#allocation2], %s1521_s10 }
  0x13   : > { %v969_v41 = vand.u32 (!%p280_p10), 4294901760, %v900_v40 }
  0x14   : > { %v440_v14 = vand.u32 (!%p280_p10), 4294901760, %v439_v10  ;;  %v451_v15 = vand.u32 (!%p280_p10), 4294901760, %v450_v11 }
  0x15   : > { %354 = vperm.xlu0 (!%p280_p10), %1628, %v346_v12   ;;  %v970_v42 = vsub.f32 (!%p280_p10), %v900_v40, %v969_v41 }
  0x16   : > { %s325_s23 = scalar_select %p324_p11, %s1701_s27, 1  ;;  %v441_v20 = vsub.f32 %v439_v10, %v440_v14  ;;  %v452_v26 = vsub.f32 %v450_v11, %v451_v15 }
  0x17   : > { %v971_v46 = vand.u32 4294901760, %v970_v42  ;;  %s1400_s27 = scalar_lea.sflag [#allocation3], %s320_s8 }
  0x18   : > { %s1531_s30 = sshll.u32 %s325_s23, 3  ;;  %v442_v25 = vand.u32 4294901760, %v441_v20  ;;  %v453_v31 = vand.u32 4294901760, %v452_v26 }
  0x19   : > { %s331_s16 = scalar_lea.vmem %s1926_s0, %s1531_s30  ;;  %s340_s19 = scalar_lea.vmem %s1932_s6, %s1531_s30  ;;  %v972_v54 = vsub.f32 %v970_v42, %v971_v46 }
  0x1a   : > { %v342_v13 = vld [vmem:[%s331_s16] sm:$0xff]  ;;  %s336_s22 = scalar_lea.vmem %s1931_s5, %s1531_s30  ;;  %s1416_s16 = sshll.u32 %s322_s15, 4  ;;  %s1879_s16 = int_to_ptr.vmem [resolvable:$true] %s1416_s16 }
  0x1b   : > { %v358_v16 = vcombine.high %v342_v13, %v342_v13  ;;  %v367_v17 = vsel %vm366_vm1, %v342_v13, 0  ;;  %v1373_v18 = vld [vmem:[%s336_s22] sm:$0xff]  ;;  %v973_v1 = vand.u32 4294901760, %v972_v54  ;;  %s1631_s20 = scalar_lea.vmem %s1879_s16, 256  ;;  %s1635_s22 = sshll.u32 %s1713_s21, 4  ;;  %s1636_s22 = int_to_ptr.vmem [resolvable:$false] %s1635_s22 }
  0x1c   : > { %v373_v19 = vand.u32 4294901760, %v367_v17  ;;  %v1381_v21 = vld [vmem:[%s340_s19] sm:$0xff]  ;;  %1376 = vperm.xlu1 %1629, %v1373_v18   ;;  %s1877_s19 = scalar_lea.hbm %s1933_s7, %s1532_s12  ;;  %p1632_p12 = scmp.ne.s32.totalorder %s1879_s16, %s1631_s20 }
  0x1d   : > { %v369_v22 = vsel %vm366_vm1, %v358_v16, 0  ;;  %1384 = vperm.xlu0 %1628, %v1381_v21   ;;  %s1637_s23 = scalar_lea.vmem %s1636_s22, 512  ;;  %p1638_p1 = scmp.lt.s32.totalorder %s1879_s16, %s1636_s22 }
  0x1e   : > { %v371_v23 = vand.u32 4294901760, %v369_v22  ;;  %v467_v24 = vsub.f32 %v367_v17, %v373_v19  ;;  %p1633_p13 = pnand %p1632_p12, %p1794_p4  ;;  %p1639_p2 = scmp.lt.s32.totalorder %s1637_s23, %s1631_s20 }
  0x20   : > { %v461_v27 = vsub.f32 %v369_v22, %v371_v23  ;;  %v468_v28 = vand.u32 4294901760, %v467_v24  ;;  %372 = vmatprep.subr.mxu1 %v371_v23  ;;  %p1634_p0 = pneg %p1633_p13  ;;  %p1640_p3 = por %p1639_p2, %p1638_p1 }
  0x21   : > { %374 = vmatpush1.msra.mxu1 %v373_v19 }
  0x22   : > { %v462_v29 = vand.u32 4294901760, %v461_v27  ;;  %v469_v30 = vsub.f32 %v467_v24, %v468_v28  ;;  %443 = vmatmul.mubr.f32.vlgmr.msra.gmra.mrb[0].mxu1 %v442_v25  ;;  %p1641_p5 = pnand %p1640_p3, %p1634_p0 }
  0x23   : > { %448 = vmatprep.mubr.f32.mxu1 %v1711_v2 }
  0x24   : > { %v463_v32 = vsub.f32 %v461_v27, %v462_v29  ;;  %v470_v33 = vand.u32 4294901760, %v469_v30 }
  0x26   : > { %v464_v34 = vand.u32 4294901760, %v463_v32  ;;  %454 = vmatmul.mubr.f32.gmra.mrb[2].mxu1 %v453_v31 }
  0x27   : > { %541 = vmatprep.mubr.f32.mxu1 %v1711_v2 }
  0x28   : > { %465 = vmatprep.subr.mxu0 %v464_v34  ;;  %1533 = vmatprep.subr.mxu1 %v464_v34 }
  0x29   : > { %471 = vmatpush1.msra.mxu0 %v470_v33  ;;  %1534 = vmatpush1.msra.mxu1 %v470_v33 }
  0x2a   : > { %536 = vmatmul.mubr.f32.vlgmr.msra.gmra.mrb[0].mxu0 %v1825_v7  ;;  %551 = vmatprep.subr.mxu0 %v461_v27 }
  0x2b   : > { %554 = vmatpush1.msra.mxu0 %v467_v24  ;;  %617 = vmatprep.mubr.f32.mxu0 %v1711_v2 }
  0x2c   : > { %635 = vmatprep.subr.mxu0 %v371_v23 }
  0x2e   : > { %543 = vmatmul.mubr.f32.vlgmr.msra.gmra.mrb[2].mxu1 %v1827_v8 }
  0x2f   : > { %968 = vmatprep.mubr.f32.mxu1 %v1711_v2 }
  0x32   : > { %620 = vmatmul.mubr.f32.vlgmr.msra.gmra.mrb[0].mxu0 %v439_v10 }
  0x33   : > { %625 = vmatprep.mubr.f32.mxu0 %v1711_v2  ;;  %637 = vmatpush1.msra.mxu0 %v373_v19 }
  0x34   : > { %722 = vmatprep.subr.mxu0 %v462_v29 }
  0x36   : > { %628 = vmatmul.mubr.f32.gmra.mrb[2].mxu0 %v450_v11 }
  0x37   : > { %700 = vmatprep.mubr.f32.mxu0 %v1711_v2 }
  0x3a   : > { %704 = vmatmul.mubr.f32.vlgmr.msra.gmra.mrb[0].mxu0 %v440_v14 }
  0x3b   : > { %709 = vmatprep.mubr.f32.mxu0 %v1711_v2  ;;  %726 = vmatpush1.msra.mxu0 %v468_v28 }
  0x3c   : > { %805 = vmatprep.subr.mxu0 %v371_v23 }
  0x3e   : > { %713 = vmatmul.mubr.f32.gmra.mrb[2].mxu0 %v451_v15 }
  0x3f   : > { %789 = vmatprep.mubr.f32.mxu0 %v1711_v2 }
  0x42   : > { %791 = vmatmul.mubr.f32.vlgmr.msra.gmra.mrb[0].mxu0 %v1825_v7 }
  0x43   : > { %796 = vmatprep.mubr.f32.mxu0 %v1711_v2  ;;  %807 = vmatpush1.msra.mxu0 %v373_v19 }
  0x46   : > { %798 = vmatmul.mubr.f32.gmra.mrb[2].mxu0 %v1827_v8 }
  0x47   : > { %870 = vmatprep.mubr.f32.mxu0 %v1711_v2 }
  0x4a   : > { %872 = vmatmul.mubr.f32.vlgmr.msra.gmra.mrb[0].mxu0 %v1825_v7 }
  0x4b   : > { %877 = vmatprep.mubr.f32.mxu0 %v1711_v2 }
  0x4e   : > { %879 = vmatmul.mubr.f32.gmra.mrb[2].mxu0 %v1827_v8 }
  0x90   : > { %v350_v43 = vpop.permute.xlu0 %349  ;;  %v896_v11 = vpop.permute.xlu1 %895 }
  0x94   : > { %v355_v50 = vpop.permute.xlu0 %354 }
  0x9b   : > { %v1377_v12 = vpop.permute.xlu1 %1376 }
  0x9c   : > { %v1385_v19 = vpop.permute.xlu0 %1384 }
  0xf5   : > { %v444_v35 = vpop.f32.mrb[0].mxu1 }
  0xf6   : > { %v446_v36 = vpop.f32.mrb[1].mxu1  ;;  %v445_v44 = vadd.f32 %v444_v35, %v350_v43 }
  0xf7   : > { %v447_v45 = vadd.f32 %v446_v36, %v350_v43 }
 0x101   : > { %v544_v37 = vpop.f32.mrb[2].mxu1 }
 0x102   : > { %v546_v38 = vpop.f32.mrb[3].mxu1  ;;  %v1539_v52 = vadd.f32 %v544_v37, %v355_v50 }
 0x103   : > { %v1541_v55 = vadd.f32 %v546_v38, %v355_v50 }
 0x11d   : > { %v873_v47 = vpop.f32.mrb[0].mxu0 }
 0x11e   : > { %v1536_v48 = vadd.f32 %v873_v47, %v445_v44  ;;  %v875_v49 = vpop.f32.mrb[1].mxu0 }
 0x11f   : > { %v1538_v51 = vadd.f32 %v875_v49, %v447_v45 }
 0x120   : > { %vm885_vm3 = vcmp.gt.f32.partialorder %v1536_v48, 0.0  ;;  %v887_v53 = vmul.f32 0.2, %v1536_v48 }
 0x121   : > { %vm886_vm4 = vcmp.gt.f32.partialorder %v1538_v51, 0.0  ;;  %v888_v56 = vmul.f32 0.2, %v1538_v51  ;;  %v880_v57 = vpop.f32.mrb[2].mxu0 }
 0x122   : > { %v889_v58 = vsel %vm885_vm3, %v1536_v48, %v887_v53  ;;  %v1540_v59 = vadd.f32 %v1539_v52, %v880_v57  ;;  %v882_v60 = vpop.f32.mrb[3].mxu0 }
 0x123   : > { %v904_v61 = vand.u32 4294901760, %v889_v58  ;;  %v890_v62 = vsel %vm886_vm4, %v1538_v51, %v888_v56  ;;  %v1542_v63 = vadd.f32 %v1541_v55, %v882_v60 }
 0x124   : > { %v902_v0 = vand.u32 4294901760, %v890_v62  ;;  %v1379_v13 = vsub.f32 %v1540_v59, %v1377_v12 }
 0x125   : > { %v987_v3 = vsub.f32 %v889_v58, %v904_v61  ;;  %v1380_v15 = vsub.f32 %v1542_v63, %v1377_v12 }
 0x126   : > { %v981_v4 = vsub.f32 %v890_v62, %v902_v0  ;;  %903 = vmatprep.subr.mxu1 %v902_v0  ;;  %v1387_v21 = vmul.f32 %v1385_v19, %v1379_v13 }
 0x127   : > { %905 = vmatpush1.msra.mxu1 %v904_v61  ;;  %v988_v5 = vand.u32 4294901760, %v987_v3 }
 0x128   : > { %974 = vmatmul.mubr.f32.vlgmr.msra.gmra.mrb[4].mxu1 %v973_v1  ;;  %v982_v6 = vand.u32 4294901760, %v981_v4 }
 0x129   : > { %v989_v7 = vsub.f32 %v987_v3, %v988_v5  ;;  %1054 = vmatprep.mubr.f32.mxu1 %v1711_v2 }
 0x12a   : > { %v983_v8 = vsub.f32 %v981_v4, %v982_v6 }
 0x12b   : > { %v990_v10 = vand.u32 4294901760, %v989_v7 }
 0x12c   : > { %v984_v9 = vand.u32 4294901760, %v983_v8 }
 0x12e   : > { %985 = vmatprep.subr.mxu1 %v984_v9 }
 0x12f   : > { %991 = vmatpush1.msra.mxu1 %v990_v10 }
 0x130   : > { %1056 = vmatmul.mubr.f32.vlgmr.msra.gmra.mrb[4].mxu1 %v969_v41  ;;  %1064 = vmatprep.subr.mxu1 %v981_v4 }
 0x131   : > { %1067 = vmatpush1.msra.mxu1 %v987_v3  ;;  %1130 = vmatprep.mubr.f32.mxu1 %v1711_v2 }
 0x132   : > { %1140 = vmatprep.subr.mxu1 %v902_v0 }
 0x138   : > { %1133 = vmatmul.mubr.f32.vlgmr.msra.gmra.mrb[4].mxu1 %v970_v42 }
 0x139   : > { %1142 = vmatpush1.msra.mxu1 %v904_v61  ;;  %1205 = vmatprep.mubr.f32.mxu1 %v1711_v2 }
 0x13a   : > { %1218 = vmatprep.subr.mxu1 %v982_v6 }
 0x140   : > { %1209 = vmatmul.mubr.f32.vlgmr.msra.gmra.mrb[4].mxu1 %v971_v46 }
 0x141   : > { %1222 = vmatpush1.msra.mxu1 %v988_v5  ;;  %1285 = vmatprep.mubr.f32.mxu1 %v1711_v2 }
 0x142   : > { %1294 = vmatprep.subr.mxu1 %v902_v0 }
 0x148   : > { %1287 = vmatmul.mubr.f32.vlgmr.msra.gmra.mrb[4].mxu1 %v969_v41 }
 0x149   : > { %1296 = vmatpush1.msra.mxu1 %v904_v61  ;;  %1359 = vmatprep.mubr.f32.mxu1 %v1711_v2  ;;  %v1388_v2 = vmul.f32 %v1385_v19, %v1380_v15 }
 0x150   : > { %1361 = vmatmul.mubr.f32.vlgmr.msra.gmra.mrb[4].mxu1 %v969_v41 }
 0x223   : > { %v1362_v14 = vpop.f32.mrb[4].mxu1 }
 0x224   : > { %v1543_v16 = vadd.f32 %v1362_v14, %v896_v11  ;;  %v1364_v17 = vpop.f32.mrb[5].mxu1 }
 0x225   : > { %v1544_v18 = vadd.f32 %v1364_v17, %v896_v11 }
 0x226   : > { %vm1367_vm5 = vcmp.gt.f32.partialorder %v1543_v16, 0.0  ;;  %v1369_v20 = vmul.f32 0.2, %v1543_v16 }
 0x227   : > { %vm1368_vm6 = vcmp.gt.f32.partialorder %v1544_v18, 0.0  ;;  %v1370_v22 = vmul.f32 0.2, %v1544_v18 }
 0x228   : > { %v1371_v23 = vsel %vm1367_vm5, %v1543_v16, %v1369_v20 }
 0x229   : > { %v1389_v24 = vadd.f32 %v1387_v21, %v1371_v23  ;;  %v1372_v25 = vsel %vm1368_vm6, %v1544_v18, %v1370_v22 }
 0x22a   : > { %v1390_v26 = vadd.f32 %v1388_v2, %v1372_v25 }
 0x22b   : > { %v1393_v27 = vmul.f32 0.2, %v1389_v24  ;;  %vm1391_vm7 = vcmp.gt.f32.partialorder %v1389_v24, 0.0 }
 0x22c   : > { %v1394_v28 = vmul.f32 0.2, %v1390_v26  ;;  %vm1392_vm8 = vcmp.gt.f32.partialorder %v1390_v26, 0.0 }
 0x22d   : > { %v1395_v29 = vsel %vm1391_vm7, %v1389_v24, %v1393_v27 }
 0x22e   : > { %v1396_v30 = vsel %vm1392_vm8, %v1390_v26, %v1394_v28  ;;  %1397 = vst [vmem:[%s322_s15] sm:$0xff] %v1395_v29 }
 0x22f   : > { %1398 = vst [vmem:[%s322_s15 + $0x8] sm:$0xff] %v1396_v30 }
 0x230   : > { %1644 = shalt.err (!%p1641_p5)
}
 0x231   : > { %s1645_s30 = scalar_lea.hbm %s1877_s19, 256  ;;  %s1649_s12 = scalar_lea.hbm %s1933_s7, 512 }
 0x232   : > { %p1646_p6 = scmp.ne.s32.totalorder %s1877_s19, %s1645_s30  ;;  %p1650_p10 = scmp.lt.u32.totalorder %s1877_s19, %s1933_s7 }
 0x233   : > { %p1651_p11 = scmp.lt.u32.totalorder %s1649_s12, %s1645_s30  ;;  %p1653_p13 = scmp.lt.u32.totalorder %s1645_s30, %s1877_s19 }
 0x234   : > { %p1647_p7 = pnand %p1646_p6, %p1794_p4 }
 0x235   : > { %p1652_p12 = por %p1651_p11, %p1650_p10 }
 0x236   : > { %p1648_p9 = pneg %p1647_p7 }
 0x237   : > { %p1654_p0 = por %p1653_p13, %p1652_p12 }
 0x239   : > { %p1655_p1 = pnand %p1654_p0, %p1648_p9 }
 0x23b   : > { %1658 = shalt.err (!%p1655_p1)
}
 0x23c   : > { %1571 = dma.vmem_to_hbm [thread:$0]  (%p1794_p4), %s1879_s16, 256, %s1877_s19, %s1400_s27  }
 0x23d PF: > { %p1577_p2 = scmp.ge.s32.totalorder %s1709_s29, 2  ;;  %s1428_s18 = sand.u32 1, %s1689_s24  }
 0x23e   : > { %s1429_s20 = scalar_lea.sflag [#allocation3], %s1428_s18 }
 0x23f   : > { %p1574_p3 = pnand %p1577_p2, %p1801_p8 }
 0x241   : > { %1684 = dma.done.wait (!%p1574_p3), %s1429_s20, 256  }
 0x242   : > { %1686 = vsyncadd (!%p1574_p3), %s1429_s20, 4294967040  ;;  %s20_s29 = sadd.s32 1, %s1709_s29   ;;  %s1936_s24 = smov %s1693_s25 }
 0x243   : > { %p17_p5 = scmp.ge.s32.totalorder %s20_s29, 4   ;;  %s1937_s25 = smov %s1697_s26 }
 0x244   : > { %s1938_s26 = smov %s1807_s14  ;;  %s1939_s27 = smov %s1705_s28 }
 0x245   : > { %s1940_s28 = smov %s1942_s9  ;;  %19 = sbr.rel (!%p17_p5) target bundleno = 4 (0x4), region = 89 }
 0x24c   :  { %1434 = vsyncpa [#allocation3], 1 }
 0x24d   :  { %1436 = vsyncpa [#allocation3 + $0x1], 1 }

</bundles_post_ra>
